<compile_context>
chip_gen: v7x
topology: tpu7x:2x2x1
jax: 0.10.0
libtpu: 0.0.40
codegen_flags: <defaults>
</compile_context>

<pallas_src>
import functools
import math

import jax
import jax.numpy as jnp
from jax.experimental import pallas as pl
from jax.experimental.pallas import tpu as pltpu


VMEM_LIMIT = 32 * 1024 * 1024   # safe on v5e/v6e/v7x; toy working set is tiny.


# ----------------------------------------------------------------------------
# in-kernel helpers
# ----------------------------------------------------------------------------

def _ln(x, g, b):
    # PyTorch LayerNorm (biased variance), f32 elementwise.
    mean = jnp.mean(x, axis=-1, keepdims=True)
    xc = x - mean
    var = jnp.mean(xc * xc, axis=-1, keepdims=True)
    return xc * jax.lax.rsqrt(var + 1e-5) * g + b


# ----------------------------------------------------------------------------
# Pallas kernels
# ----------------------------------------------------------------------------

def _vis_embed_kernel(pp_ref, w_ref, base_ref, g_ref, b_ref, o_ref):
    # pp_ref:   (1, S_pad, C*P*P) patches, row 0 and pad rows are zeros
    # base_ref: (S_pad, D)        row 0 = cls + pos[0], rows 1..N = pos, pads 0
    # fused: patch matmul + cls/pos add + ln_pre
    x = jnp.dot(pp_ref[0], w_ref[...], preferred_element_type=jnp.float32)
    x = x + base_ref[...]
    o_ref[0] = _ln(x, g_ref[...], b_ref[...])


def _block_kernel(x_ref, mask_ref,
                  ln1_g_ref, ln1_b_ref,
                  wq_ref, bq_ref, wk_ref, bk_ref, wv_ref, bv_ref,
                  wo_ref, bo_ref,
                  ln2_g_ref, ln2_b_ref,
                  wfc_ref, bfc_ref, wpj_ref, bpj_ref,
                  o_ref, *, n_heads, scale):
    # One full transformer residual block for one batch element.
    x = x_ref[0]                                          # (S, D)
    S, D = x.shape
    mask = mask_ref[...]                                  # (S, S) additive

    # ---- attention branch -------------------------------------------------
    h1 = _ln(x, ln1_g_ref[...], ln1_b_ref[...])           # (S, D)
    acc = jnp.zeros((S, D), jnp.float32)
    for h in range(n_heads):                              # static unroll
        q = jnp.dot(h1, wq_ref[h], preferred_element_type=jnp.float32) + bq_ref[h]
        k = jnp.dot(h1, wk_ref[h], preferred_element_type=jnp.float32) + bk_ref[h]
        v = jnp.dot(h1, wv_ref[h], preferred_element_type=jnp.float32) + bv_ref[h]
        # scores: q @ k^T via dot_general (contract last dims)
        s = jax.lax.dot_general(q, k, (((1,), (1,)), ((), ())),
                                preferred_element_type=jnp.float32)
        s = s * scale + mask
        s = s - jnp.max(s, axis=-1, keepdims=True)
        p = jnp.exp(s)
        p = p * pl.reciprocal(jnp.sum(p, axis=-1, keepdims=True), approx=True)
        o_h = jnp.dot(p, v, preferred_element_type=jnp.float32)          # (S, Dh)
        # fold the head directly into the output projection (no concat)
        acc = acc + jnp.dot(o_h, wo_ref[h], preferred_element_type=jnp.float32)
    x = x + acc + bo_ref[...]                             # residual 1

    # ---- MLP branch ---------------------------------------------------------
    h2 = _ln(x, ln2_g_ref[...], ln2_b_ref[...])
    f = jnp.dot(h2, wfc_ref[...], preferred_element_type=jnp.float32) + bfc_ref[...]
    # QuickGELU: x * sigmoid(1.702 x)  (reciprocal on the EUP path)
    f = f * pl.reciprocal(1.0 + jnp.exp(-1.702 * f), approx=True)
    m = jnp.dot(f, wpj_ref[...], preferred_element_type=jnp.float32) + bpj_ref[...]
    o_ref[0] = x + m                                      # residual 2


def _head_kernel(img_ref, txt_ref,
                 lnp_g_ref, lnp_b_ref, pv_ref,
                 lnf_g_ref, lnf_b_ref, pt_ref,
                 fcv_ref, fct_ref, fcb_ref, o_ref):
    # vision ln_post + visual proj, text ln_final + text proj, fusion + fc.
    fi = jnp.dot(_ln(img_ref[...], lnp_g_ref[...], lnp_b_ref[...]), pv_ref[...],
                 preferred_element_type=jnp.float32)       # (B, E)
    ft = jnp.dot(_ln(txt_ref[...], lnf_g_ref[...], lnf_b_ref[...]), pt_ref[...],
                 preferred_element_type=jnp.float32)       # (B, E)
    # concat fusion == fi @ W[:E] + ft @ W[E:]; sum fusion == both halves = W.
    o_ref[...] = (jnp.dot(fi, fcv_ref[...], preferred_element_type=jnp.float32)
                  + jnp.dot(ft, fct_ref[...], preferred_element_type=jnp.float32)
                  + fcb_ref[...])


# ----------------------------------------------------------------------------
# pallas_call wrappers
# ----------------------------------------------------------------------------

def vis_embed(pp, v):
    B, S_pad, CPP = pp.shape
    D = v["width"]
    return pl.pallas_call(
        _vis_embed_kernel,
        out_shape=jax.ShapeDtypeStruct((B, S_pad, D), jnp.float32),
        grid=(B,),
        in_specs=[
            pl.BlockSpec((1, S_pad, CPP), lambda b: (b, 0, 0)),
            pl.BlockSpec((CPP, D), lambda b: (0, 0)),
            pl.BlockSpec((S_pad, D), lambda b: (0, 0)),
            pl.BlockSpec((1, D), lambda b: (0, 0)),
            pl.BlockSpec((1, D), lambda b: (0, 0)),
        ],
        out_specs=pl.BlockSpec((1, S_pad, D), lambda b: (b, 0, 0)),
        compiler_params=pltpu.CompilerParams(
            dimension_semantics=("parallel",), vmem_limit_bytes=VMEM_LIMIT),
    )(pp, v["conv_w"], v["embed_base"], v["ln_pre_g"], v["ln_pre_b"])


def residual_block(x, mask, blk, n_heads):
    B, S, D = x.shape
    H = n_heads
    Dh = D // H
    F = blk["w_fc"].shape[1]
    kern = functools.partial(_block_kernel, n_heads=H, scale=1.0 / math.sqrt(Dh))

    def const(shape):
        return pl.BlockSpec(shape, lambda b, _s=shape: (0,) * len(_s))

    return pl.pallas_call(
        kern,
        out_shape=jax.ShapeDtypeStruct((B, S, D), jnp.float32),
        grid=(B,),
        in_specs=[
            pl.BlockSpec((1, S, D), lambda b: (b, 0, 0)),   # x
            const((S, S)),                                  # additive mask
            const((1, D)), const((1, D)),                   # ln1
            const((H, D, Dh)), const((H, 1, Dh)),           # wq, bq
            const((H, D, Dh)), const((H, 1, Dh)),           # wk, bk
            const((H, D, Dh)), const((H, 1, Dh)),           # wv, bv
            const((H, Dh, D)), const((1, D)),               # wo, bo
            const((1, D)), const((1, D)),                   # ln2
            const((D, F)), const((1, F)),                   # mlp fc
            const((F, D)), const((1, D)),                   # mlp proj
        ],
        out_specs=pl.BlockSpec((1, S, D), lambda b: (b, 0, 0)),
        compiler_params=pltpu.CompilerParams(
            dimension_semantics=("parallel",), vmem_limit_bytes=VMEM_LIMIT),
    )(x, mask,
      blk["ln1_g"], blk["ln1_b"],
      blk["wq"], blk["bq"], blk["wk"], blk["bk"], blk["wv"], blk["bv"],
      blk["wo"], blk["bo"],
      blk["ln2_g"], blk["ln2_b"],
      blk["w_fc"], blk["b_fc"], blk["w_pj"], blk["b_pj"])


def fusion_head(img_cls, txt_eot, params):
    B, Dv = img_cls.shape
    Dt = txt_eot.shape[1]
    E = params["visual"]["proj"].shape[1]
    O = params["fc_b"].shape[1]
    return pl.pallas_call(
        _head_kernel,
        out_shape=jax.ShapeDtypeStruct((B, O), jnp.float32),
        grid=(1,),
        in_specs=[
            pl.BlockSpec((B, Dv), lambda i: (0, 0)),
            pl.BlockSpec((B, Dt), lambda i: (0, 0)),
            pl.BlockSpec((1, Dv), lambda i: (0, 0)),
            pl.BlockSpec((1, Dv), lambda i: (0, 0)),
            pl.BlockSpec((Dv, E), lambda i: (0, 0)),
            pl.BlockSpec((1, Dt), lambda i: (0, 0)),
            pl.BlockSpec((1, Dt), lambda i: (0, 0)),
            pl.BlockSpec((Dt, E), lambda i: (0, 0)),
            pl.BlockSpec((E, O), lambda i: (0, 0)),
            pl.BlockSpec((E, O), lambda i: (0, 0)),
            pl.BlockSpec((1, O), lambda i: (0, 0)),
        ],
        out_specs=pl.BlockSpec((B, O), lambda i: (0, 0)),
        compiler_params=pltpu.CompilerParams(
            dimension_semantics=("arbitrary",), vmem_limit_bytes=VMEM_LIMIT),
    )(img_cls, txt_eot,
      params["visual"]["ln_post_g"], params["visual"]["ln_post_b"],
      params["visual"]["proj"],
      params["text"]["ln_final_g"], params["text"]["ln_final_b"],
      params["text"]["proj"],
      params["fc_wv"], params["fc_wt"], params["fc_b"])


# ----------------------------------------------------------------------------
# forward pass (glue: patchify / pad / gathers / reshapes only)
# ----------------------------------------------------------------------------

def clip_encoder_forward(image, text, params):
    v, t = params["visual"], params["text"]

    # ---- image branch -------------------------------------------------------
    B, C, H, W = image.shape
    P, D = v["patch_size"], v["width"]
    nH, nW = H // P, W // P
    N = nH * nW
    S_pad = v["seq_pad"]
    # conv(stride=P, kernel=P, bias=False) == patchify + matmul (matmul in kernel)
    patches = image.reshape(B, C, nH, P, nW, P).transpose(0, 2, 4, 1, 3, 5)
    patches = patches.reshape(B, N, C * P * P)
    # row 0 reserved for cls token, trailing rows are sublane padding
    pp = jnp.pad(patches, ((0, 0), (1, S_pad - 1 - N), (0, 0)))
    x = vis_embed(pp, v)                                  # (B, S_pad, D)
    for blk in v["blocks"]:
        x = residual_block(x, v["mask"], blk, v["heads"])
    img_cls = x[:, 0, :]                                  # (B, D)

    # ---- text branch --------------------------------------------------------
    Bt, L = text.shape
    xt = jnp.take(t["token_emb"], text, axis=0) + t["pos_emb"][None]   # (B, L, Dt)
    for blk in t["blocks"]:
        xt = residual_block(xt, t["mask"], blk, t["heads"])
    eot = jnp.argmax(text, axis=-1)                       # EOT = highest token id
    txt_eot = xt[jnp.arange(Bt), eot]                     # (B, Dt)  (LN commutes w/ row select)

    # ---- fusion + fc + reshape ---------------------------------------------
    out = fusion_head(img_cls, txt_eot, params)           # (B, C_out*W_out)
    return out.reshape(B, params["output_channels"], 1, params["target_width"])


# ----------------------------------------------------------------------------
# Deterministic parameter construction (scaled-down ViT-B/32 structure),
# packed ONCE into kernel-friendly layouts ((K, N) weights, (1, N) biases,
# per-head (H, D, Dh)/(H, Dh, D) attention weights).
# ----------------------------------------------------------------------------

def _init_block(key, D, H):
    Dh = D // H
    ks = jax.random.split(key, 4)
    s = 0.02
    # PyTorch-layout random weights, converted once below.
    w_in = jax.random.normal(ks[0], (3 * D, D), jnp.float32) * s      # (3D, D)
    b_in = jnp.zeros((3 * D,), jnp.float32)
    w_out = jax.random.normal(ks[1], (D, D), jnp.float32) * s
    b_out = jnp.zeros((D,), jnp.float32)
    w_fc = jax.random.normal(ks[2], (4 * D, D), jnp.float32) * s
    b_fc = jnp.zeros((4 * D,), jnp.float32)
    w_pj = jax.random.normal(ks[3], (D, 4 * D), jnp.float32) * s
    b_pj = jnp.zeros((D,), jnp.float32)

    def per_head_w(w):           # (D_out, D_in) -> (H, D_in, Dh)
        return w.T.reshape(D, H, Dh).transpose(1, 0, 2)

    def per_head_b(b):           # (D,) -> (H, 1, Dh)
        return b.reshape(H, 1, Dh)

    return dict(
        ln1_g=jnp.ones((1, D), jnp.float32), ln1_b=jnp.zeros((1, D), jnp.float32),
        wq=per_head_w(w_in[0:D]),        bq=per_head_b(b_in[0:D]),
        wk=per_head_w(w_in[D:2 * D]),    bk=per_head_b(b_in[D:2 * D]),
        wv=per_head_w(w_in[2 * D:3 * D]), bv=per_head_b(b_in[2 * D:3 * D]),
        wo=w_out.T.reshape(H, Dh, D),    bo=b_out.reshape(1, D),
        ln2_g=jnp.ones((1, D), jnp.float32), ln2_b=jnp.zeros((1, D), jnp.float32),
        w_fc=w_fc.T, b_fc=b_fc.reshape(1, 4 * D),
        w_pj=w_pj.T, b_pj=b_pj.reshape(1, D),
    )


def init_params(key, *, img_size, patch_size, vis_width, vis_heads, vis_layers,
                vocab, ctx_len, txt_width, txt_heads, txt_layers, embed_dim,
                output_channels, target_width, fusion_method):
    assert fusion_method in ("concat", "sum")
    keys = jax.random.split(key, 12)
    s = 0.02
    n_patches = (img_size // patch_size) ** 2
    S = n_patches + 1
    S_pad = ((S + 7) // 8) * 8                     # pad tokens to sublane multiple

    conv_w = jax.random.normal(
        keys[0], (vis_width, 3, patch_size, patch_size), jnp.float32) * s
    class_emb = jax.random.normal(keys[1], (vis_width,), jnp.float32) * s
    pos_emb = jax.random.normal(keys[2], (S, vis_width), jnp.float32) * s
    embed_base = (jnp.zeros((S_pad, vis_width), jnp.float32)
                  .at[:S].set(pos_emb)
                  .at[0].add(class_emb))
    # additive key mask: pad key columns get -1e30 (pad rows stay finite)
    key_mask = jnp.where(jnp.arange(S_pad) >= S,
                         jnp.float32(-1e30), jnp.float32(0.0))
    vis_mask = jnp.tile(key_mask[None, :], (S_pad, 1))

    visual = dict(
        patch_size=patch_size, width=vis_width, heads=vis_heads,
        seq=S, seq_pad=S_pad,
        conv_w=conv_w.reshape(vis_width, -1).T,                     # (3*P*P, D)
        embed_base=embed_base,
        mask=vis_mask,
        ln_pre_g=jnp.ones((1, vis_width), jnp.float32),
        ln_pre_b=jnp.zeros((1, vis_width), jnp.float32),
        ln_post_g=jnp.ones((1, vis_width), jnp.float32),
        ln_post_b=jnp.zeros((1, vis_width), jnp.float32),
        proj=jax.random.normal(keys[3], (vis_width, embed_dim), jnp.float32) * s,
        blocks=[_init_block(k, vis_width, vis_heads)
                for k in jax.random.split(keys[4], vis_layers)],
    )

    causal = jnp.triu(jnp.full((ctx_len, ctx_len), -1e30, jnp.float32), k=1)
    textp = dict(
        width=txt_width, heads=txt_heads,
        token_emb=jax.random.normal(keys[5], (vocab, txt_width), jnp.float32) * s,
        pos_emb=jax.random.normal(keys[6], (ctx_len, txt_width), jnp.float32) * s,
        mask=causal,
        ln_final_g=jnp.ones((1, txt_width), jnp.float32),
        ln_final_b=jnp.zeros((1, txt_width), jnp.float32),
        proj=jax.random.normal(keys[7], (txt_width, embed_dim), jnp.float32) * s,
        blocks=[_init_block(k, txt_width, txt_heads)
                for k in jax.random.split(keys[8], txt_layers)],
    )

    fc_out = output_channels * target_width
    if fusion_method == "concat":
        fc_w = jax.random.normal(keys[9], (fc_out, 2 * embed_dim), jnp.float32) * s
        fc_wt_full = fc_w.T                                         # (2E, O)
        fc_wv, fc_wt = fc_wt_full[:embed_dim], fc_wt_full[embed_dim:]
    else:   # sum fusion: (fi + ft) @ W == fi @ W + ft @ W
        fc_w = jax.random.normal(keys[9], (fc_out, embed_dim), jnp.float32) * s
        fc_wv = fc_wt = fc_w.T

    return dict(
        visual=visual, text=textp,
        fc_wv=fc_wv, fc_wt=fc_wt,
        fc_b=jnp.zeros((1, fc_out), jnp.float32),
        output_channels=output_channels, target_width=target_width,
    )


# ----------------------------------------------------------------------------
# Main
# ----------------------------------------------------------------------------

if __name__ == "__main__":
    B = 2
    IMG, PATCH = 32, 8              # 16 patches + 1 cls token (padded to 24)
    VIS_W, VIS_H, VIS_L = 64, 4, 2
    VOCAB, CTX, TXT_W, TXT_H, TXT_L = 64, 8, 32, 4, 2
    EMBED = 64
    OUT_C, TGT_W = 8, 16            # scaled-down (480, 150)
    FUSION = "concat"

    key = jax.random.PRNGKey(0)
    k_param, k_img, k_txt = jax.random.split(key, 3)

    params = init_params(
        k_param, img_size=IMG, patch_size=PATCH, vis_width=VIS_W, vis_heads=VIS_H,
        vis_layers=VIS_L, vocab=VOCAB, ctx_len=CTX, txt_width=TXT_W,
        txt_heads=TXT_H, txt_layers=TXT_L, embed_dim=EMBED,
        output_channels=OUT_C, target_width=TGT_W, fusion_method=FUSION,
    )

    image = jax.random.normal(k_img, (B, 3, IMG, IMG), jnp.float32)    # NCHW
    text = jax.random.randint(k_txt, (B, CTX), 1, VOCAB - 1)
    text = text.at[:, CTX - 1].set(VOCAB - 1).astype(jnp.int32)        # EOT token

    out = clip_encoder_forward(image, text, params)
    out = jax.block_until_ready(out)

    assert out.shape == (B, OUT_C, 1, TGT_W), out.shape
    assert bool(jnp.all(jnp.isfinite(out)))
    print("KERNEL_OK")
</pallas_src>

<mosaic_0001>
module attributes {stable_mosaic.version = 11 : i64} {
  func.func @_vis_embed_kernel(%arg0: i32, %arg1: memref<1x24x192xf32, #tpu.memory_space<vmem>>, %arg2: memref<192x64xf32, #tpu.memory_space<vmem>>, %arg3: memref<24x64xf32, #tpu.memory_space<vmem>>, %arg4: memref<1x64xf32, #tpu.memory_space<vmem>>, %arg5: memref<1x64xf32, #tpu.memory_space<vmem>>, %arg6: memref<1x24x64xf32, #tpu.memory_space<vmem>>) attributes {dimension_semantics = [#tpu.dimension_semantics<parallel>], iteration_bounds = array<i64: 2>, scalar_prefetch = 0 : i64, scratch_operands = 0 : i64, tpu.core_type = #tpu.core_type<tc>, window_params = [{transform_indices = @transform_0, window_bounds = array<i64: 1, 24, 192>}, {pipeline_mode = #tpu.pipeline_mode<synchronous>, transform_indices = @transform_1, window_bounds = array<i64: 192, 64>}, {pipeline_mode = #tpu.pipeline_mode<synchronous>, transform_indices = @transform_2, window_bounds = array<i64: 24, 64>}, {pipeline_mode = #tpu.pipeline_mode<synchronous>, transform_indices = @transform_3, window_bounds = array<i64: 1, 64>}, {pipeline_mode = #tpu.pipeline_mode<synchronous>, transform_indices = @transform_4, window_bounds = array<i64: 1, 64>}, {transform_indices = @transform_5, window_bounds = array<i64: 1, 24, 64>}]} {
    %c0 = arith.constant 0 : index
    %c0_0 = arith.constant 0 : index
    %c0_1 = arith.constant 0 : index
    %0 = vector.load %arg1[%c0, %c0_0, %c0_1] : memref<1x24x192xf32, #tpu.memory_space<vmem>>, vector<1x24x192xf32>
    %1 = vector.shape_cast %0 : vector<1x24x192xf32> to vector<24x192xf32>
    %c0_2 = arith.constant 0 : index
    %c0_3 = arith.constant 0 : index
    %2 = vector.load %arg2[%c0_2, %c0_3] : memref<192x64xf32, #tpu.memory_space<vmem>>, vector<192x64xf32>
    %cst = arith.constant dense<0.000000e+00> : vector<24x64xf32>
    %3 = tpu.matmul %1, %2, %cst {dimension_numbers = #tpu.dot_dimension_numbers<[1], [0], [0], [1], [0, 0, 1, 1], [], []>} : vector<24x192xf32>, vector<192x64xf32>, vector<24x64xf32> -> vector<24x64xf32>
    %c0_4 = arith.constant 0 : index
    %c0_5 = arith.constant 0 : index
    %4 = vector.load %arg3[%c0_4, %c0_5] : memref<24x64xf32, #tpu.memory_space<vmem>>, vector<24x64xf32>
    %5 = arith.addf %3, %4 : vector<24x64xf32>
    %c0_6 = arith.constant 0 : index
    %c0_7 = arith.constant 0 : index
    %6 = vector.load %arg4[%c0_6, %c0_7] : memref<1x64xf32, #tpu.memory_space<vmem>>, vector<1x64xf32>
    %c0_8 = arith.constant 0 : index
    %c0_9 = arith.constant 0 : index
    %7 = vector.load %arg5[%c0_8, %c0_9] : memref<1x64xf32, #tpu.memory_space<vmem>>, vector<1x64xf32>
    %cst_10 = arith.constant dense<0.000000e+00> : vector<24xf32>
    %8 = vector.multi_reduction <add>, %5, %cst_10 [1] : vector<24x64xf32> to vector<24xf32>
    %9 = vector.shape_cast %8 : vector<24xf32> to vector<24x1xf32>
    %cst_11 = arith.constant 6.400000e+01 : f32
    %10 = vector.broadcast %cst_11 : f32 to vector<24x1xf32>
    %11 = arith.divf %9, %10 : vector<24x1xf32>
    %12 = vector.broadcast %11 : vector<24x1xf32> to vector<24x64xf32>
    %13 = arith.subf %5, %12 : vector<24x64xf32>
    %14 = arith.mulf %13, %13 : vector<24x64xf32>
    %cst_12 = arith.constant dense<0.000000e+00> : vector<24xf32>
    %15 = vector.multi_reduction <add>, %14, %cst_12 [1] : vector<24x64xf32> to vector<24xf32>
    %16 = vector.shape_cast %15 : vector<24xf32> to vector<24x1xf32>
    %cst_13 = arith.constant 6.400000e+01 : f32
    %17 = vector.broadcast %cst_13 : f32 to vector<24x1xf32>
    %18 = arith.divf %16, %17 : vector<24x1xf32>
    %cst_14 = arith.constant 9.99999974E-6 : f32
    %19 = vector.broadcast %cst_14 : f32 to vector<24x1xf32>
    %20 = arith.addf %18, %19 : vector<24x1xf32>
    %21 = math.rsqrt %20 : vector<24x1xf32>
    %22 = vector.broadcast %21 : vector<24x1xf32> to vector<24x64xf32>
    %23 = arith.mulf %13, %22 : vector<24x64xf32>
    %24 = vector.broadcast %6 : vector<1x64xf32> to vector<24x64xf32>
    %25 = arith.mulf %23, %24 : vector<24x64xf32>
    %26 = vector.broadcast %7 : vector<1x64xf32> to vector<24x64xf32>
    %27 = arith.addf %25, %26 : vector<24x64xf32>
    %c0_15 = arith.constant 0 : index
    %c0_16 = arith.constant 0 : index
    %c0_17 = arith.constant 0 : index
    %28 = vector.load %arg6[%c0_15, %c0_16, %c0_17] : memref<1x24x64xf32, #tpu.memory_space<vmem>>, vector<1x24x64xf32>
    %29 = vector.shape_cast %28 : vector<1x24x64xf32> to vector<24x64xf32>
    %30 = vector.shape_cast %27 : vector<24x64xf32> to vector<1x24x64xf32>
    tpu.vector_store %arg6[%c0_15, %c0_16, %c0_17], %30 {strides = array<i32>} : memref<1x24x64xf32, #tpu.memory_space<vmem>>, vector<1x24x64xf32>,
    return
  }
  func.func @transform_0(%arg0: i32) -> (i32, i32, i32) {
    %c0_i32 = arith.constant 0 : i32
    %c0_i32_0 = arith.constant 0 : i32
    %c0_i32_1 = arith.constant 0 : i32
    return %arg0, %c0_i32, %c0_i32_0 : i32, i32, i32
  }
  func.func @transform_1(%arg0: i32) -> (i32, i32) {
    %c0_i32 = arith.constant 0 : i32
    %c0_i32_0 = arith.constant 0 : i32
    %c0_i32_1 = arith.constant 0 : i32
    return %c0_i32, %c0_i32_0 : i32, i32
  }
  func.func @transform_2(%arg0: i32) -> (i32, i32) {
    %c0_i32 = arith.constant 0 : i32
    %c0_i32_0 = arith.constant 0 : i32
    %c0_i32_1 = arith.constant 0 : i32
    return %c0_i32, %c0_i32_0 : i32, i32
  }
  func.func @transform_3(%arg0: i32) -> (i32, i32) {
    %c0_i32 = arith.constant 0 : i32
    %c0_i32_0 = arith.constant 0 : i32
    %c0_i32_1 = arith.constant 0 : i32
    return %c0_i32, %c0_i32_0 : i32, i32
  }
  func.func @transform_4(%arg0: i32) -> (i32, i32) {
    %c0_i32 = arith.constant 0 : i32
    %c0_i32_0 = arith.constant 0 : i32
    %c0_i32_1 = arith.constant 0 : i32
    return %c0_i32, %c0_i32_0 : i32, i32
  }
  func.func @transform_5(%arg0: i32) -> (i32, i32, i32) {
    %c0_i32 = arith.constant 0 : i32
    %c0_i32_0 = arith.constant 0 : i32
    %c0_i32_1 = arith.constant 0 : i32
    return %arg0, %c0_i32, %c0_i32_0 : i32, i32, i32
  }
}

</mosaic_0001>

<bundles_post_ra>
// kernel: tpu_custom_call.1
= control target key start
LH: loop header
LB: loop body
LE: loop exit
PB: predicated region body
PF: predicated region fallthrough
CT: control target
= control target key end

     0   :  { %10 = vsyncpa [#allocation3], 0  ;;  %s941_s0 = inlined_call_operand.vmem [shape: f32[2,24,192], index: 0, kind: input, shape index: {}]   ;;  %s942_s1 = inlined_call_operand.vmem [shape: f32[192,64], index: 1, kind: input, shape index: {}]   ;;  %s943_s2 = inlined_call_operand.vmem [shape: f32[24,64], index: 2, kind: input, shape index: {}]   ;;  %s944_s3 = inlined_call_operand.vmem [shape: f32[1,64], index: 3, kind: input, shape index: {}]   ;;  %s945_s4 = inlined_call_operand.vmem [shape: f32[1,64], index: 4, kind: input, shape index: {}]   ;;  %s946_s5 = inlined_call_operand.hbm [shape: f32[2,24,64], index: 5, kind: output, shape index: {}]  }
   0x1   :  { %12 = vsyncpa [#allocation3 + $0x1], 0  ;;  %s707_s18 = smov 0   ;;  %s709_s19 = smov 0  }
   0x2   :  { %s711_s20 = smov 0   ;;  %s713_s21 = smov 0  }
   0x3 LB: > { %s728_s22 = sadd.s32 4294967295, %s671_s21   ;;  %s485_s23 = sadd.s32 4294967294, %s671_s21   ;;  %s671_s21 = sphi %s713_s21, %s952_s21   ;;  %s667_s20 = sphi %s711_s20, %s951_s20   ;;  %s663_s19 = sphi %s709_s19, %s950_s19   ;;  %s659_s18 = sphi %s707_s18, %s949_s18  }
   0x4   : > { %s732_s24 = sadd.s32 1, %s671_s21   ;;  %s135_s25 = sadd.s32 1, %s667_s20 }
   0x5   : > { %s132_s26 = ssub.s32 %s671_s21, %s732_s24  ;;  %p145_p0 = scmp.ne.s32.totalorder %s667_s20, %s663_s19 }
   0x6   : > { %p133_p1 = scmp.eq.s32.totalorder %s132_s26, 0  ;;  %p146_p2 = scmp.eq.s32.totalorder %s728_s22, 1 }
   0x7   : > { %p151_p3 = scmp.ne.s32.totalorder %s663_s19, %s659_s18  ;;  %p152_p4 = scmp.eq.s32.totalorder %s485_s23, 1 }
   0x8   : > { %s743_s27 = scalar_select %p133_p1, %s667_s20, %s135_s25  }
   0x9   : > { %p745_p5 = por %p146_p2, %p145_p0  ;;  %p749_p6 = por %p152_p4, %p151_p3 }
   0xa   : > { %p488_p7 = scmp.ge.s32.totalorder %s671_s21, 1  ;;  %p190_p8 = scmp.lt.s32.totalorder %s671_s21, 3 }
   0xc   : > { %p191_p9 = pnand %p488_p7, %p190_p8 }
   0xd   : > { %v229_v0 = vld [vmem:[%s942_s1] sm:$0xff] (!%p191_p9)  ;;  %v230_v1 = vld [vmem:[%s942_s1 + $0x8] sm:$0xff] (!%p191_p9)  ;;  %v231_v2 = vld [vmem:[%s942_s1 + $0x10] sm:$0xff] (!%p191_p9)  ;;  %p218_p10 = scmp.lt.s32.totalorder (!%p191_p9), %s728_s22, 1  ;;  %v673_v3 = vmov (!%p191_p9), 0.0|0.0   ;;  %vm256_vm0 = vcmask (!%p191_p9), 523264  }
   0xe   : > { %194 = sbr.rel (%p191_p9) target bundleno = 610 (0x262), region = 40  ;;  %498 = vmatprep.subr.bf16.mxu0 (!%p191_p9), %v673_v3  ;;  %534 = vmatprep.subr.bf16.mxu1 (!%p191_p9), %v673_v3  ;;  %v499_v4 = vpack.c.bf16 (!%p191_p9), %v230_v1, %v229_v0  ;;  %v232_v5 = vld [vmem:[%s942_s1 + $0x18] sm:$0xff] (!%p191_p9)  ;;  %v233_v7 = vld [vmem:[%s942_s1 + $0x20] sm:$0xff] (!%p191_p9)  ;;  %v234_v8 = vld [vmem:[%s942_s1 + $0x28] sm:$0xff] (!%p191_p9)  ;;  %s674_s15 = smov (!%p191_p9), [#allocation2]  }
   0xf   : > { %v502_v6 = vpack.c.bf16 (!%p191_p9), %v232_v5, %v231_v2  ;;  %v505_v9 = vpack.c.bf16 (!%p191_p9), %v234_v8, %v233_v7  ;;  %v235_v10 = vld [vmem:[%s942_s1 + $0x30] sm:$0xff] (!%p191_p9)  ;;  %v236_v11 = vld [vmem:[%s942_s1 + $0x38] sm:$0xff] (!%p191_p9)  ;;  %v237_v15 = vld [vmem:[%s942_s1 + $0x40] sm:$0xff] (!%p191_p9)  ;;  %s560_s8 = smul.u32 (!%p191_p9), 384, %s728_s22  ;;  %s613_s16 = sshll.u32 (!%p191_p9), %s674_s15, 4  ;;  %s614_s16 = int_to_ptr.vmem [resolvable:$false] %s613_s16 }
  0x10   : > { %500 = vmatpush1.bf16.msra.mxu0 (!%p191_p9), %v499_v4  ;;  %546 = vmatpush1.bf16.msra.mxu1 (!%p191_p9), %v499_v4  ;;  %v508_v14 = vpack.c.bf16 (!%p191_p9), %v236_v11, %v235_v10  ;;  %v238_v16 = vld [vmem:[%s942_s1 + $0x48] sm:$0xff] (!%p191_p9)  ;;  %v239_v18 = vld [vmem:[%s942_s1 + $0x50] sm:$0xff] (!%p191_p9)  ;;  %v240_v19 = vld [vmem:[%s942_s1 + $0x58] sm:$0xff] (!%p191_p9)  ;;  %s615_s17 = scalar_lea.vmem (!%p191_p9), %s614_s16, 768 }
  0x11   : > { %501 = vmatprep.subr.bf16.mxu0 (!%p191_p9), %v673_v3  ;;  %535 = vmatprep.subr.bf16.mxu1 (!%p191_p9), %v673_v3  ;;  %v511_v17 = vpack.c.bf16 (!%p191_p9), %v238_v16, %v237_v15  ;;  %v514_v20 = vpack.c.bf16 (!%p191_p9), %v240_v19, %v239_v18  ;;  %v241_v21 = vld [vmem:[%s942_s1 + $0x60] sm:$0xff] (!%p191_p9)  ;;  %v242_v22 = vld [vmem:[%s942_s1 + $0x68] sm:$0xff] (!%p191_p9)  ;;  %v243_v24 = vld [vmem:[%s942_s1 + $0x70] sm:$0xff] (!%p191_p9) }
  0x12   : > { %v517_v23 = vpack.c.bf16 (!%p191_p9), %v242_v22, %v241_v21  ;;  %v244_v25 = vld [vmem:[%s942_s1 + $0x78] sm:$0xff] (!%p191_p9)  ;;  %v245_v27 = vld [vmem:[%s942_s1 + $0x80] sm:$0xff] (!%p191_p9)  ;;  %v246_v28 = vld [vmem:[%s942_s1 + $0x88] sm:$0xff] (!%p191_p9) }
  0x13   : > { %v520_v26 = vpack.c.bf16 (!%p191_p9), %v244_v25, %v243_v24  ;;  %v523_v29 = vpack.c.bf16 (!%p191_p9), %v246_v28, %v245_v27  ;;  %v247_v30 = vld [vmem:[%s942_s1 + $0x90] sm:$0xff] (!%p191_p9)  ;;  %v248_v31 = vld [vmem:[%s942_s1 + $0x98] sm:$0xff] (!%p191_p9)  ;;  %v249_v33 = vld [vmem:[%s942_s1 + $0xa0] sm:$0xff] (!%p191_p9) }
  0x14   : > { %503 = vmatpush1.bf16.msra.mxu0 (!%p191_p9), %v502_v6  ;;  %547 = vmatpush1.bf16.msra.mxu1 (!%p191_p9), %v502_v6  ;;  %v526_v32 = vpack.c.bf16 (!%p191_p9), %v248_v31, %v247_v30  ;;  %v250_v34 = vld [vmem:[%s942_s1 + $0xa8] sm:$0xff] (!%p191_p9)  ;;  %v251_v36 = vld [vmem:[%s942_s1 + $0xb0] sm:$0xff] (!%p191_p9)  ;;  %v252_v37 = vld [vmem:[%s942_s1 + $0xb8] sm:$0xff] (!%p191_p9) }
  0x15   : > { %s219_s13 = scalar_select %p218_p10, %s728_s22, 1  ;;  %504 = vmatprep.subr.bf16.mxu0 %v673_v3  ;;  %536 = vmatprep.subr.bf16.mxu1 %v673_v3  ;;  %v529_v35 = vpack.c.bf16 %v250_v34, %v249_v33  ;;  %v532_v38 = vpack.c.bf16 %v252_v37, %v251_v36  ;;  %v253_v43 = vld [vmem:[%s943_s2] sm:$0xff]  ;;  %v254_v45 = vld [vmem:[%s943_s2 + $0x8] sm:$0xff]  ;;  %v255_v50 = vld [vmem:[%s943_s2 + $0x10] sm:$0xff] }
  0x16   : > { %v493_v19 = vld [vmem:[%s944_s3] ss:$0 sm:$0xff] }
  0x17   : > { %s559_s23 = smul.u32 48, %s219_s13  ;;  %v494_v21 = vld [vmem:[%s945_s4] ss:$0 sm:$0xff]  ;;  %s894_s13 = scalar_lea.hbm %s946_s5, %s560_s8 }
  0x18   : > { %506 = vmatpush1.bf16.msra.mxu0 %v505_v9  ;;  %548 = vmatpush1.bf16.msra.mxu1 %v505_v9 }
  0x19   : > { %s782_s30 = scalar_lea.vmem %s941_s0, %s559_s23  ;;  %507 = vmatprep.subr.bf16.mxu0 %v673_v3  ;;  %537 = vmatprep.subr.bf16.mxu1 %v673_v3 }
  0x1a   : > { %v224_v12 = vld [vmem:[%s782_s30 + $0x8] sm:$0xff]  ;;  %v226_v13 = vld [vmem:[%s782_s30 + $0x18] sm:$0xff]  ;;  %v223_v39 = vld [vmem:[%s782_s30] sm:$0xff] }
  0x1b   : > { %490 = vmatprep.mubr.msk.f32.mxu0 %vm256_vm0, %v224_v12  ;;  %491 = vmatprep.mubr.msk.f32.mxu1 %vm256_vm0, %v226_v13  ;;  %v225_v40 = vld [vmem:[%s782_s30 + $0x10] sm:$0xff]  ;;  %v228_v41 = vld [vmem:[%s782_s30 + $0x28] sm:$0xff]  ;;  %v227_v42 = vld [vmem:[%s782_s30 + $0x20] sm:$0xff]  ;;  %s215_s30 = sand.u32 1, %s663_s19  }
  0x1c   : > { %509 = vmatpush1.bf16.msra.mxu0 %v508_v14  ;;  %549 = vmatpush1.bf16.msra.mxu1 %v508_v14  ;;  %s558_s26 = smul.u32 24, %s215_s30  ;;  %s900_s22 = scalar_lea.sflag [#allocation3], %s215_s30 }
  0x1d   : > { %510 = vmatprep.subr.bf16.mxu0 %v673_v3  ;;  %538 = vmatprep.subr.bf16.mxu1 %v673_v3 }
  0x1e   : > { %s217_s9 = scalar_lea.vmem [#allocation2], %s558_s26 }
  0x1f   : > { %s423_s10 = sshll.u32 %s217_s9, 4  ;;  %s896_s10 = int_to_ptr.vmem [resolvable:$true] %s423_s10 }
  0x20   : > { %512 = vmatpush1.bf16.msra.mxu0 %v511_v17  ;;  %550 = vmatpush1.bf16.msra.mxu1 %v511_v17  ;;  %s609_s14 = scalar_lea.vmem %s896_s10, 384  ;;  %p616_p0 = scmp.lt.s32.totalorder %s896_s10, %s614_s16 }
  0x21   : > { %513 = vmatprep.subr.bf16.mxu0 %v673_v3  ;;  %539 = vmatprep.subr.bf16.mxu1 %v673_v3  ;;  %p610_p11 = scmp.ne.s32.totalorder %s896_s10, %s609_s14  ;;  %p617_p1 = scmp.lt.s32.totalorder %s615_s17, %s609_s14 }
  0x23   : > { %p611_p12 = pnand %p610_p11, %p745_p5  ;;  %p618_p2 = por %p617_p1, %p616_p0 }
  0x24   : > { %515 = vmatpush1.bf16.msra.mxu0 %v514_v20  ;;  %551 = vmatpush1.bf16.msra.mxu1 %v514_v20 }
  0x25   : > { %516 = vmatprep.subr.bf16.mxu0 %v673_v3  ;;  %540 = vmatprep.subr.bf16.mxu1 %v673_v3  ;;  %p612_p13 = pneg %p611_p12 }
  0x27   : > { %p619_p3 = pnand %p618_p2, %p612_p13 }
  0x28   : > { %518 = vmatpush1.bf16.msra.mxu0 %v517_v23  ;;  %552 = vmatpush1.bf16.msra.mxu1 %v517_v23 }
  0x29   : > { %519 = vmatprep.subr.bf16.mxu0 %v673_v3  ;;  %541 = vmatprep.subr.bf16.mxu1 %v673_v3 }
  0x2c   : > { %521 = vmatpush1.bf16.msra.mxu0 %v520_v26  ;;  %553 = vmatpush1.bf16.msra.mxu1 %v520_v26 }
  0x2d   : > { %522 = vmatprep.subr.bf16.mxu0 %v673_v3  ;;  %542 = vmatprep.subr.bf16.mxu1 %v673_v3 }
  0x30   : > { %524 = vmatpush1.bf16.msra.mxu0 %v523_v29  ;;  %554 = vmatpush1.bf16.msra.mxu1 %v523_v29 }
  0x31   : > { %525 = vmatprep.subr.bf16.mxu0 %v673_v3  ;;  %543 = vmatprep.subr.bf16.mxu1 %v673_v3 }
  0x34   : > { %527 = vmatpush1.bf16.msra.mxu0 %v526_v32  ;;  %555 = vmatpush1.bf16.msra.mxu1 %v526_v32 }
  0x35   : > { %528 = vmatprep.subr.bf16.mxu0 %v673_v3  ;;  %544 = vmatprep.subr.bf16.mxu1 %v673_v3 }
  0x38   : > { %530 = vmatpush1.bf16.msra.mxu0 %v529_v35  ;;  %556 = vmatpush1.bf16.msra.mxu1 %v529_v35 }
  0x39   : > { %531 = vmatprep.subr.bf16.mxu0 %v673_v3  ;;  %545 = vmatprep.subr.bf16.mxu1 %v673_v3 }
  0x3c   : > { %533 = vmatpush1.bf16.msra.mxu0 %v532_v38  ;;  %557 = vmatpush1.bf16.msra.mxu1 %v532_v38 }
  0x3f   : > { %331 = vmatmul.mubr.f32.vlgmr.msra.gmra.mrb[0].mxu0 %v223_v39  ;;  %336 = vmatmul.mubr.f32.vlgmr.msra.gmra.mrb[0].mxu1 %v225_v40 }
  0x40   : > { %492 = vmatprep.mubr.msk.f32.mxu1 %vm256_vm0, %v228_v41 }
  0x43   : > { %341 = vmatmul.mubr.f32.gmra.mrb[2].mxu1 %v227_v42 }
 0x112   : > { %v332_v44 = vpop.f32.mrb[0].mxu0  ;;  %v337_v46 = vpop.f32.mrb[0].mxu1 }
 0x113   : > { %v333_v47 = vadd.f32 %v332_v44, %v253_v43  ;;  %v334_v48 = vpop.f32.mrb[1].mxu0  ;;  %v339_v49 = vpop.f32.mrb[1].mxu1  ;;  %v338_v51 = vadd.f32 %v337_v46, %v254_v45 }
 0x115   : > { %v348_v52 = vsel %vm256_vm0, %v333_v47, 0.0  ;;  %v351_v57 = vsel %vm256_vm0, %v338_v51, 0.0 }
 0x116   : > { %v342_v53 = vpop.f32.mrb[2].mxu1  ;;  %349 = vadd.xlane.f32.xlu0 %v348_v52 }
 0x117   : > { %v343_v54 = vadd.f32 %v342_v53, %v255_v50  ;;  %v344_v55 = vpop.f32.mrb[3].mxu1 }
 0x119   : > { %v354_v56 = vsel %vm256_vm0, %v343_v54, 0.0 }
 0x11a   : > { %355 = vadd.xlane.f32.xlu1 %v354_v56  ;;  %352 = vadd.xlane.f32.xlu0 %v351_v57 }
 0x1a3   : > { %v350_v58 = vpop.xlane.xlu0 %349 }
 0x1a4   : > { %v358_v59 = vmul.f32 0.015625, %v350_v58 }
 0x1a6   : > { %v361_v60 = vsub.f32 %v333_v47, %v358_v59 }
 0x1a7   : > { %v356_v61 = vpop.xlane.xlu1 %355  ;;  %v353_v62 = vpop.xlane.xlu0 %352 }
 0x1a8   : > { %v360_v63 = vmul.f32 0.015625, %v356_v61  ;;  %v359_v0 = vmul.f32 0.015625, %v353_v62  ;;  %v364_v1 = vmul.f32 %v361_v60, %v361_v60 }
 0x1aa   : > { %v363_v2 = vsub.f32 %v343_v54, %v360_v63  ;;  %v362_v3 = vsub.f32 %v338_v51, %v359_v0  ;;  %v367_v4 = vsel %vm256_vm0, %v364_v1, 0.0 }
 0x1ab   : > { %368 = vadd.xlane.f32.xlu1 %v367_v4 }
 0x1ac   : > { %v366_v5 = vmul.f32 %v363_v2, %v363_v2  ;;  %v365_v6 = vmul.f32 %v362_v3, %v362_v3 }
 0x1ae   : > { %v373_v7 = vsel %vm256_vm0, %v366_v5, 0.0  ;;  %v370_v8 = vsel %vm256_vm0, %v365_v6, 0.0 }
 0x1af   : > { %374 = vadd.xlane.f32.xlu1 %v373_v7  ;;  %371 = vadd.xlane.f32.xlu0 %v370_v8 }
 0x238   : > { %v369_v9 = vpop.xlane.xlu1 %368 }
 0x239   : > { %v376_v10 = vmul.f32 0.015625, %v369_v9 }
 0x23b   : > { %v379_v11 = vadd.f32 1e-05, %v376_v10 }
 0x23c   : > { %v375_v12 = vpop.xlane.xlu1 %374  ;;  %v372_v13 = vpop.xlane.xlu0 %371 }
 0x23d   : > { %603 = vrsqrt.f32 %v379_v11  ;;  %v378_v14 = vmul.f32 0.015625, %v375_v12  ;;  %v377_v15 = vmul.f32 0.015625, %v372_v13 }
 0x23f   : > { %v381_v16 = vadd.f32 1e-05, %v378_v14  ;;  %v380_v17 = vadd.f32 1e-05, %v377_v15 }
 0x241   : > { %605 = vrsqrt.f32 %v381_v16 }
 0x242   : > { %607 = vrsqrt.f32 %v380_v17 }
 0x247   : > { %v604_v18 = vpop.eup %603 }
 0x248   : > { %v385_v20 = vmul.f32 %v604_v18, %v361_v60 }
 0x24a   : > { %v394_v22 = vmul.f32 %v493_v19, %v385_v20 }
 0x24b   : > { %v606_v23 = vpop.eup %605 }
 0x24c   : > { %v608_v24 = vpop.eup %607  ;;  %v403_v25 = vadd.f32 %v494_v21, %v394_v22  ;;  %v387_v26 = vmul.f32 %v606_v23, %v363_v2 }
 0x24d   : > { %v386_v27 = vmul.f32 %v608_v24, %v362_v3 }
 0x24e   : > { %v396_v28 = vmul.f32 %v493_v19, %v387_v26  ;;  %406 = vst.msk [vmem:[%s217_s9] sm:$0xff] %vm256_vm0, %v403_v25 }
 0x24f   : > { %v395_v29 = vmul.f32 %v493_v19, %v386_v27 }
 0x250   : > { %v405_v30 = vadd.f32 %v494_v21, %v396_v28 }
 0x251   : > { %v404_v31 = vadd.f32 %v494_v21, %v395_v29 }
 0x252   : > { %408 = vst.msk [vmem:[%s217_s9 + $0x10] sm:$0xff] %vm256_vm0, %v405_v30 }
 0x253   : > { %407 = vst.msk [vmem:[%s217_s9 + $0x8] sm:$0xff] %vm256_vm0, %v404_v31 }
 0x254   : > { %622 = shalt.err (!%p619_p3)
}
 0x255   : > { %s623_s30 = scalar_lea.hbm %s894_s13, 384  ;;  %s627_s26 = scalar_lea.hbm %s946_s5, 768 }
 0x256   : > { %p624_p4 = scmp.ne.s32.totalorder %s894_s13, %s623_s30  ;;  %p628_p9 = scmp.lt.u32.totalorder %s894_s13, %s946_s5 }
 0x257   : > { %p629_p10 = scmp.lt.u32.totalorder %s627_s26, %s623_s30  ;;  %p631_p12 = scmp.lt.u32.totalorder %s623_s30, %s894_s13 }
 0x258   : > { %p625_p7 = pnand %p624_p4, %p745_p5 }
 0x259   : > { %p630_p11 = por %p629_p10, %p628_p9 }
 0x25a   : > { %p626_p8 = pneg %p625_p7 }
 0x25b   : > { %p632_p13 = por %p631_p12, %p630_p11 }
 0x25d   : > { %p633_p0 = pnand %p632_p13, %p626_p8 }
 0x25f   : > { %636 = shalt.err (!%p633_p0)
}
 0x260   : > { %s675_s8 = smov 128   ;;  %s676_s9 = smov 8  }
 0x261   : > { %561 = dma.vmem_to_hbm [thread:$0]  (%p745_p5), %s896_s10, 384, %s894_s13, %s900_s22, %s675_s8, %s675_s8, %s676_s9  }
 0x262 PF: > { %p567_p1 = scmp.ge.s32.totalorder %s671_s21, 2  ;;  %s438_s11 = sand.u32 1, %s659_s18  }
 0x263   : > { %s439_s12 = scalar_lea.sflag [#allocation3], %s438_s11 }
 0x264   : > { %p564_p2 = pnand %p567_p1, %p749_p6 }
 0x266   : > { %654 = dma.done.wait (!%p564_p2), %s439_s12, 384  }
 0x267   : > { %656 = vsyncadd (!%p564_p2), %s439_s12, 4294966912  ;;  %p15_p3 = scmp.ge.s32.totalorder %s732_s24, 4   ;;  %s949_s18 = smov %s663_s19 }
 0x268   : > { %s950_s19 = smov %s667_s20  ;;  %s951_s20 = smov %s743_s27 }
 0x269   : > { %s952_s21 = smov %s732_s24  ;;  %17 = sbr.rel (!%p15_p3) target bundleno = 3 (0x3), region = 75 }
 0x270   :  { %444 = vsyncpa [#allocation3], 1 }
 0x271   :  { %446 = vsyncpa [#allocation3 + $0x1], 1 }

</bundles_post_ra>
